<compile_context>
chip_gen: v5e
topology: v5e:2x2
jax: 0.10.0
libtpu: 0.0.40
codegen_flags: <defaults>
</compile_context>

<pallas_src>
import functools

import jax
import jax.numpy as jnp
from jax.experimental import pallas as pl
from jax.experimental.pallas import tpu as pltpu

_TARGET_BLOCK_BYTES = 4 * 1024 * 1024   # ~4 MiB input-side blocks
_VMEM_LIMIT_BYTES = 40 * 1024 * 1024    # double-buffered in+out blocks fit easily
_MIN_PALLAS_BYTES = 256 * 1024          # below this, fused XLA multiply is cheaper


def _scale_kernel(s_ref, x_ref, o_ref):
    # s_ref: (1,) f32 scalar parameter in SMEM; x_ref / o_ref: VMEM tiles.
    o_ref[...] = (x_ref[...] * s_ref[0]).astype(o_ref.dtype)


def _cdiv(a, b):
    return -(-a // b)


def _prod(xs):
    out = 1
    for v in xs:
        out *= v
    return out


def _plan_blocks(shape, itemsize, target_bytes):
    """Pick (block_shape, grid) tiling the ORIGINAL shape (no wrapper reshape).

    The last two dims of each block are either full-extent or 8-aligned, so the
    (8, 128) BlockSpec rule is always satisfied and no relayout copies appear
    around the pallas_call.  Returns None for degenerate shapes (fallback to a
    fused XLA multiply).
    """
    ndim = len(shape)
    if ndim < 2:
        return None
    H, W = shape[-2], shape[-1]
    row_bytes = W * itemsize
    tail_bytes = H * row_bytes

    if ndim >= 3 and tail_bytes <= target_bytes:
        # Block along dim -3; keep the (H, W) tail full-extent.
        D = shape[-3]
        outer = shape[:-3]
        bd = max(1, min(D, target_bytes // tail_bytes))
        grid = tuple(outer) + (_cdiv(D, bd),)
        if _prod(grid) == 1 and D >= 2:
            # Keep >= 2 blocks so both v7x TensorCores stream.
            bd = _cdiv(D, 2)
            grid = tuple(outer) + (_cdiv(D, bd),)
        block = (1,) * len(outer) + (bd, H, W)
        return block, grid

    # Block the second-minor dim in multiples of 8, full-extent last dim.
    if H < 8 or 8 * row_bytes > target_bytes:
        return None
    lead = shape[:-2]
    bh = (target_bytes // row_bytes) // 8 * 8
    bh = max(8, min(bh, H))
    n_rows = _cdiv(H, bh)
    if _prod(lead) * n_rows == 1 and H >= 16:
        # Split so both v7x TensorCores get a block; tail is edge-masked.
        bh = max(8, ((_cdiv(H, 2) + 7) // 8) * 8)
        n_rows = _cdiv(H, bh)
    block = (1,) * len(lead) + (bh, W)
    grid = tuple(lead) + (n_rows,)
    return block, grid


@functools.lru_cache(maxsize=None)
def _build_scale_call(shape, out_dtype_name, block, grid):
    ndim = len(shape)
    n_grid = len(grid)

    def imap(*g):
        # Grid axes map 1:1 onto the leading / blocked dims; trailing dims
        # (full-extent in the block) always use block index 0.
        return tuple(g) + (0,) * (ndim - n_grid)

    return pl.pallas_call(
        _scale_kernel,
        out_shape=jax.ShapeDtypeStruct(shape, jnp.dtype(out_dtype_name)),
        grid_spec=pltpu.PrefetchScalarGridSpec(
            num_scalar_prefetch=0,
            grid=grid,
            in_specs=[
                # scalar parameter: whole (1,) array resident in SMEM
                pl.BlockSpec(memory_space=pltpu.MemorySpace.SMEM),
                pl.BlockSpec(block, imap),
            ],
            out_specs=pl.BlockSpec(block, imap),
        ),
        compiler_params=pltpu.CompilerParams(
            dimension_semantics=("parallel",) * n_grid,
            vmem_limit_bytes=_VMEM_LIMIT_BYTES,
        ),
    )


def scale_forward(x, scale, *, min_pallas_bytes=_MIN_PALLAS_BYTES):
    """Pallas equivalent of _Scale.forward: x * scale, scale has shape (1,)."""
    s = jnp.asarray(scale, jnp.float32).reshape(1)
    # Match torch dtype promotion: bf16/fp16 input * f32 Parameter -> f32 out.
    out_dtype = jnp.promote_types(x.dtype, s.dtype)

    nbytes = x.size * jnp.dtype(x.dtype).itemsize
    plan = None
    if x.ndim >= 2 and nbytes >= min_pallas_bytes:
        plan = _plan_blocks(tuple(x.shape), jnp.dtype(x.dtype).itemsize,
                            _TARGET_BLOCK_BYTES)
    if plan is None:
        # Tiny FPN levels / degenerate shapes: a fused XLA multiply is cheaper
        # than a custom-call launch + pipeline warm-up.
        return (x * s).astype(out_dtype)

    block, grid = plan
    call = _build_scale_call(tuple(x.shape), jnp.dtype(out_dtype).name, block, grid)
    return call(s, x)


def init_scale_param(init_value=1.0):
    """Matches _Scale.__init__: a single learnable scalar, default 1.0."""
    return jnp.array([init_value], jnp.float32)


if __name__ == "__main__":
    key = jax.random.PRNGKey(0)
    k_x, k_s, k1, k2, k3, k4 = jax.random.split(key, 6)

    scale_default = init_scale_param(1.0)
    scale = jax.random.uniform(k_s, (1,), jnp.float32, 0.5, 2.0)

    def check(out, x, s):
        ref = x * s
        assert out.shape == ref.shape, (out.shape, ref.shape)
        assert out.dtype == ref.dtype, (out.dtype, ref.dtype)
        assert jnp.allclose(out, ref, atol=1e-6, rtol=1e-6), (
            "mismatch: max abs diff "
            f"{jnp.max(jnp.abs(out.astype(jnp.float32) - ref.astype(jnp.float32)))}")

    # 1) Canonical small FCOS head map (2, 4, 16, 16):
    #    a) default path -> fused XLA fallback (tiny tensor),
    #    b) forced Pallas path to exercise the kernel on the canonical shape.
    x_small = jax.random.normal(k_x, (2, 4, 16, 16), jnp.float32)
    check(jax.block_until_ready(scale_forward(x_small, scale_default)),
          x_small, scale_default)
    check(jax.block_until_ready(scale_forward(x_small, scale, min_pallas_bytes=0)),
          x_small, scale)

    # 2) FCOS stride-8 style feature map -> Pallas path, W not a multiple of 128
    #    (masked vst accepted in exchange for zero relayout copies).
    x_p3 = jax.random.normal(k1, (2, 8, 100, 136), jnp.float32)
    check(jax.block_until_ready(scale_forward(x_p3, scale)), x_p3, scale)

    # 3) Larger map -> multi-MiB blocks, grid of >= 2 "parallel" blocks.
    x_big = jax.random.normal(k2, (2, 4, 256, 512), jnp.float32)
    check(jax.block_until_ready(scale_forward(x_big, scale)), x_big, scale)

    # 4) Rank-2 input with a ragged last row-block -> Pallas edge masking.
    x_2d = jax.random.normal(k3, (1000, 384), jnp.float32)
    check(jax.block_until_ready(scale_forward(x_2d, scale)), x_2d, scale)

    # 5) bf16 input: output promotes to f32, matching torch `input * f32 param`.
    x_bf16 = jax.random.normal(k4, (2, 4, 128, 256), jnp.float32).astype(jnp.bfloat16)
    out_bf = jax.block_until_ready(scale_forward(x_bf16, scale))
    ref_bf = x_bf16 * scale
    assert out_bf.dtype == ref_bf.dtype == jnp.float32
    assert jnp.allclose(out_bf, ref_bf, atol=1e-6, rtol=1e-6)

    print("KERNEL_OK")
</pallas_src>

<mosaic_0001>
module attributes {stable_mosaic.version = 11 : i64} {
  func.func @_scale_kernel(%arg0: i32, %arg1: i32, %arg2: memref<1xf32, #tpu.memory_space<smem>>, %arg3: memref<1x4x16x16xf32, #tpu.memory_space<vmem>>, %arg4: memref<1x4x16x16xf32, #tpu.memory_space<vmem>>) attributes {dimension_semantics = [#tpu.dimension_semantics<parallel>, #tpu.dimension_semantics<parallel>], iteration_bounds = array<i64: 2, 1>, scalar_prefetch = 0 : i64, scratch_operands = 0 : i64, tpu.core_type = #tpu.core_type<tc>, window_params = [{transform_indices = @transform_0, window_bounds = array<i64: 1>}, {transform_indices = @transform_1, window_bounds = array<i64: 1, 4, 16, 16>}, {transform_indices = @transform_2, window_bounds = array<i64: 1, 4, 16, 16>}]} {
    %c0 = arith.constant 0 : index
    %c0_0 = arith.constant 0 : index
    %c0_1 = arith.constant 0 : index
    %c0_2 = arith.constant 0 : index
    %0 = vector.load %arg3[%c0, %c0_0, %c0_1, %c0_2] : memref<1x4x16x16xf32, #tpu.memory_space<vmem>>, vector<1x4x16x16xf32>
    %c0_3 = arith.constant 0 : index
    %1 = memref.load %arg2[%c0_3] : memref<1xf32, #tpu.memory_space<smem>>
    %2 = vector.broadcast %1 : f32 to vector<1x4x16x16xf32>
    %3 = arith.mulf %0, %2 : vector<1x4x16x16xf32>
    %c0_4 = arith.constant 0 : index
    %c0_5 = arith.constant 0 : index
    %c0_6 = arith.constant 0 : index
    %c0_7 = arith.constant 0 : index
    %4 = vector.load %arg4[%c0_4, %c0_5, %c0_6, %c0_7] : memref<1x4x16x16xf32, #tpu.memory_space<vmem>>, vector<1x4x16x16xf32>
    tpu.vector_store %arg4[%c0_4, %c0_5, %c0_6, %c0_7], %3 {strides = array<i32>} : memref<1x4x16x16xf32, #tpu.memory_space<vmem>>, vector<1x4x16x16xf32>,
    return
  }
  func.func @transform_0(%arg0: i32, %arg1: i32) -> i32 {
    %c0_i32 = arith.constant 0 : i32
    %c0_i32_0 = arith.constant 0 : i32
    return %c0_i32 : i32
  }
  func.func @transform_1(%arg0: i32, %arg1: i32) -> (i32, i32, i32, i32) {
    %c0_i32 = arith.constant 0 : i32
    %c0_i32_0 = arith.constant 0 : i32
    %c0_i32_1 = arith.constant 0 : i32
    return %arg0, %arg1, %c0_i32, %c0_i32_0 : i32, i32, i32, i32
  }
  func.func @transform_2(%arg0: i32, %arg1: i32) -> (i32, i32, i32, i32) {
    %c0_i32 = arith.constant 0 : i32
    %c0_i32_0 = arith.constant 0 : i32
    %c0_i32_1 = arith.constant 0 : i32
    return %arg0, %arg1, %c0_i32, %c0_i32_0 : i32, i32, i32, i32
  }
}

</mosaic_0001>

<bundles_post_ra>
// kernel: tpu_custom_call.1
= control target key start
LH: loop header
LB: loop body
LE: loop exit
PB: predicated region body
PF: predicated region fallthrough
CT: control target
= control target key end

     0   :  { %s666_s0 = inlined_call_operand.<no memory space> [shape: f32[1], index: 0, kind: input, shape index: {}]   ;;  %s667_s1 = inlined_call_operand.hbm [shape: f32[2,4,16,16], index: 1, kind: input, shape index: {}]   ;;  %s668_s2 = inlined_call_operand.hbm [shape: f32[2,4,16,16], index: 2, kind: output, shape index: {}]  }
   0x1   :  { %7 = sst [smem:[#allocation2]] %s666_s0 }
   0x2   :  { %8 = vsyncpa [#allocation4], 0 }
   0x3   :  { %10 = vsyncpa [#allocation4 + $0x1], 0 }
   0x4   :  { %11 = vsyncpa [#allocation5], 0 }
   0x5   :  { %13 = vsyncpa [#allocation5 + $0x1], 0  ;;  %s538_s11 = smov 0   ;;  %s540_s12 = smov 0  }
   0x6   :  { %s542_s13 = smov 0   ;;  %s544_s14 = smov 0  }
   0x7   :  { %s546_s15 = smov 0   ;;  %s548_s16 = smov 0  }
   0x8 LB: > { %s319_s0 = sadd.s32 4294967295, %s514_s16   ;;  %s320_s17 = sadd.s32 4294967294, %s514_s16   ;;  %s514_s16 = sphi %s548_s16, %s19_s16   ;;  %s510_s15 = sphi %s546_s15, %s677_s15   ;;  %s506_s14 = sphi %s544_s14, %s676_s14   ;;  %s502_s13 = sphi %s542_s13, %s675_s13   ;;  %s498_s12 = sphi %s540_s12, %s674_s12   ;;  %s494_s11 = sphi %s538_s11, %s673_s11  }
   0x9   : > { %s31_s18 = sadd.s32 1, %s510_s15  ;;  %s61_s19 = sadd.s32 1, %s502_s13 }
   0xa   : > { %p33_p0 = scmp.ge.s32.totalorder %s31_s18, 2  ;;  %p68_p1 = scmp.ne.s32.totalorder %s502_s13, %s498_s12 }
   0xb   : > { %p69_p2 = scmp.eq.s32.totalorder %s514_s16, 0  ;;  %p74_p3 = scmp.ne.s32.totalorder %s498_s12, %s494_s11 }
   0xc   : > { %s679_s18 = smov (%p33_p0, %s31_s18), 0  ;;  %p75_p5 = scmp.eq.s32.totalorder %s319_s0, 0 }
   0xd   : > { %p579_p4 = por %p69_p2, %p68_p1  ;;  %s56_s21 = ssub.s32 %s510_s15, %s679_s18 }
   0xe   : > { %p100_p6 = scmp.eq.s32.totalorder %s319_s0, 1  ;;  %p59_p7 = scmp.eq.s32.totalorder %s56_s21, 0 }
   0xf   : > { %p585_p8 = por %p75_p5, %p74_p3  ;;  %p106_p10 = scmp.eq.s32.totalorder %s320_s17, 1 }
  0x10   : > { %p589_p9 = por %p100_p6, %p68_p1  ;;  %p322_p12 = scmp.ge.s32.totalorder %s514_s16, 2 }
  0x11   : > { %s594_s24 = scalar_select %p59_p7, %s502_s13, %s61_s19  }
  0x12   : > { %p596_p11 = por %p106_p10, %p74_p3  ;;  %p348_p13 = scmp.lt.s32.totalorder %s514_s16, 2 }
  0x13   : > { %s129_s26 = sand.u32 1, %s502_s13   ;;  %s334_s28 = sshll.u32 %s510_s15, 6 }
  0x14   : > { %s323_s27 = sshll.u32 %s129_s26, 6  ;;  %s141_s3 = scalar_lea.hbm %s667_s1, %s334_s28 }
  0x15   : > { %s133_s4 = scalar_lea.vmem [#allocation3], %s323_s27  ;;  %s142_s6 = sshll.u32 %s141_s3, 4  ;;  %s143_s6 = int_to_ptr.hbm [resolvable:$true] %s142_s6 }
  0x16   : > { %s144_s5 = sshll.u32 %s133_s4, 4  ;;  %p341_p0 = pnand %p348_p13, %p579_p4  ;;  %s145_s5 = int_to_ptr.vmem [resolvable:$true] %s144_s5 }
  0x17   : > { %p326_p1 = scmp.ge.s32.totalorder %s514_s16, 1  ;;  %s130_s7 = scalar_lea.sflag [#allocation4], %s129_s26 }
  0x18   : > { %s516_s8 = smov 128   ;;  %s517_s9 = smov 8  }
  0x19   : > { %343 = dma.hbm_to_vmem [thread:$0]  (!%p341_p0), %s143_s6, 1024, %s145_s5, %s130_s7, %s516_s8, %s516_s8, %s517_s9  }
  0x1a   : > { %p152_p2 = scmp.lt.s32.totalorder %s514_s16, 3 }
  0x1c   : > { %p153_p3 = pnand %p326_p1, %p152_p2 }
  0x1d   : > { %s612_s10 = sand.u32 (!%p153_p3), 1, %s498_s12  }
  0x1e   : > { %156 = sbr.rel (%p153_p3) target bundleno = 56 (0x38), region = 28  ;;  %s327_s0 = sshll.u32 (!%p153_p3), %s612_s10, 6 }
  0x1f   : > { %s159_s17 = scalar_lea.sflag (!%p153_p3), [#allocation4], %s612_s10  ;;  %s162_s19 = scalar_lea.vmem (!%p153_p3), [#allocation3], %s327_s0 }
  0x23   : > { %485 = dma.done.wait (%p585_p8), %s159_s17, 1024  }
  0x24   : > { %487 = vsyncadd (%p585_p8), %s159_s17, 4294966272  ;;  %s194_s20 = sld [smem:[#allocation2]]  ;;  %s335_s21 = sshll.u32 %s506_s14, 6  ;;  %v186_v0 = vld [vmem:[%s162_s19] sm:$0xff]  ;;  %vm204_vm0 = vcmask 130048   ;;  %v187_v2 = vld [vmem:[%s162_s19 + $0x8] sm:$0xff] }
  0x25   : > { %v188_v3 = vld [vmem:[%s162_s19 + $0x10] sm:$0xff]  ;;  %v189_v7 = vld [vmem:[%s162_s19 + $0x18] sm:$0xff]  ;;  %v190_v8 = vld [vmem:[%s162_s19 + $0x20] sm:$0xff]  ;;  %s228_s22 = scalar_lea.hbm %s668_s2, %s335_s21  ;;  %s183_s28 = scalar_lea.vmem [#allocation6], %s327_s0 }
  0x26   : > { %v191_v9 = vld [vmem:[%s162_s19 + $0x28] sm:$0xff]  ;;  %v192_v11 = vld [vmem:[%s162_s19 + $0x30] sm:$0xff]  ;;  %v193_v13 = vld [vmem:[%s162_s19 + $0x38] sm:$0xff]  ;;  %s229_s14 = sshll.u32 %s183_s28, 4  ;;  %s231_s29 = sshll.u32 %s228_s22, 4  ;;  %s230_s14 = int_to_ptr.vmem [resolvable:$true] %s229_s14  ;;  %s232_s29 = int_to_ptr.hbm [resolvable:$true] %s231_s29 }
  0x27   : > { %s214_s30 = scalar_lea.sflag [#allocation5], %s612_s10  ;;  %s446_s3 = sshra.s32 %s232_s29, 4  ;;  %s447_s3 = int_to_ptr.hbm [resolvable:$true] %s446_s3 }
  0x28   : > { %s448_s4 = scalar_lea.hbm %s447_s3, 64  ;;  %s452_s7 = scalar_lea.hbm %s668_s2, 128 }
  0x29   : > { %p449_p4 = scmp.ne.s32.totalorder %s447_s3, %s448_s4  ;;  %p453_p7 = scmp.lt.s32.totalorder %s447_s3, %s668_s2 }
  0x2a   : > { %v195_v1 = vstv %s194_s20  ;;  %p454_p8 = scmp.lt.s32.totalorder %s452_s7, %s448_s4 }
  0x2b   : > { %v196_v4 = vmul.f32 %v195_v1, %v186_v0  ;;  %v197_v5 = vmul.f32 %v195_v1, %v187_v2  ;;  %v198_v6 = vmul.f32 %v195_v1, %v188_v3  ;;  %v199_v10 = vmul.f32 %v195_v1, %v189_v7  ;;  %p450_p5 = pnand %p449_p4, %p589_p9 }
  0x2c   : > { %v200_v12 = vmul.f32 %v195_v1, %v190_v8  ;;  %v201_v14 = vmul.f32 %v195_v1, %v191_v9  ;;  %v202_v15 = vmul.f32 %v195_v1, %v192_v11  ;;  %v203_v16 = vmul.f32 %v195_v1, %v193_v13  ;;  %p455_p10 = por %p454_p8, %p453_p7 }
  0x2d   : > { %205 = vst.msk [vmem:[%s183_s28] sm:$0xff] %vm204_vm0, %v196_v4  ;;  %p451_p6 = pneg %p450_p5 }
  0x2e   : > { %206 = vst.msk [vmem:[%s183_s28 + $0x8] sm:$0xff] %vm204_vm0, %v197_v5 }
  0x2f   : > { %207 = vst.msk [vmem:[%s183_s28 + $0x10] sm:$0xff] %vm204_vm0, %v198_v6  ;;  %p456_p13 = pnand %p455_p10, %p451_p6 }
  0x30   : > { %208 = vst.msk [vmem:[%s183_s28 + $0x18] sm:$0xff] %vm204_vm0, %v199_v10 }
  0x31   : > { %209 = vst.msk [vmem:[%s183_s28 + $0x20] sm:$0xff] %vm204_vm0, %v200_v12 }
  0x32   : > { %210 = vst.msk [vmem:[%s183_s28 + $0x28] sm:$0xff] %vm204_vm0, %v201_v14 }
  0x33   : > { %211 = vst.msk [vmem:[%s183_s28 + $0x30] sm:$0xff] %vm204_vm0, %v202_v15 }
  0x34   : > { %212 = vst.msk [vmem:[%s183_s28 + $0x38] sm:$0xff] %vm204_vm0, %v203_v16 }
  0x35   : > { %459 = shalt.err (!%p456_p13)
}
  0x36   : > { %s518_s10 = smov 128   ;;  %s519_s0 = smov 8  }
  0x37   : > { %338 = dma.vmem_to_hbm [thread:$0]  (%p589_p9), %s230_s14, 1024, %s232_s29, %s214_s30, %s518_s10, %s518_s10, %s519_s0  }
  0x38 PF: > { %s246_s17 = sand.u32 1, %s494_s11   ;;  %p345_p0 = pnand %p322_p12, %p596_p11 }
  0x39   : > { %s247_s19 = scalar_lea.sflag [#allocation5], %s246_s17 }
  0x3a   : > { %p346_p1 = pneg %p345_p0 }
  0x3c   : > { %489 = dma.done.wait (%p346_p1), %s247_s19, 1024  }
  0x3d   : > { %491 = vsyncadd (%p346_p1), %s247_s19, 4294966272  ;;  %s19_s16 = sadd.s32 1, %s514_s16   ;;  %s673_s11 = smov %s498_s12 }
  0x3e   : > { %p16_p2 = scmp.ge.s32.totalorder %s19_s16, 4   ;;  %s674_s12 = smov %s502_s13 }
  0x3f   : > { %s675_s13 = smov %s594_s24  ;;  %s676_s14 = smov %s510_s15 }
  0x40   : > { %s677_s15 = smov %s679_s18  ;;  %18 = sbr.rel (!%p16_p2) target bundleno = 8 (0x8), region = 73 }
  0x45   :  { %253 = vsyncpa [#allocation4], 1 }
  0x46   :  { %255 = vsyncpa [#allocation4 + $0x1], 1 }
  0x47   :  { %256 = vsyncpa [#allocation5], 1 }
  0x48   :  { %258 = vsyncpa [#allocation5 + $0x1], 1 }

</bundles_post_ra>
